<compile_context>
chip_gen: v6e
topology: v6e:2x2x1
jax: 0.10.0
libtpu: 0.0.40
codegen_flags: <defaults>
</compile_context>

<pallas_src>
import jax
import jax.numpy as jnp
from jax.experimental import pallas as pl
from jax.experimental.pallas import tpu as pltpu


def gru_relu_kernel(x_ref, wih_ref, whh_ref, gib_ref, bhhn_ref, o_ref):
    """Full GRU recurrence over T steps + ReLU on the final hidden state.

    x_ref:    (T*B, I)  bf16  time-major input rows
    wih_ref:  (I, 3H)   bf16  W_ih^T, gate order [r, z, n]
    whh_ref:  (H, 3H)   bf16  W_hh^T, gate order [r, z, n]
    gib_ref:  (1, 3H)   f32   b_ih + [b_hh_r, b_hh_z, 0]  (r/z hidden bias folded)
    bhhn_ref: (1, H)    f32   b_hh_n (must sit under the r* multiply)
    o_ref:    (B, H)    f32   relu(h_T)
    """
    TB = x_ref.shape[0]
    B, H = o_ref.shape
    T = TB // B

    # (1) Hoisted input projection: ONE bf16 MXU matmul covering every time
    #     step, f32 accumulate, bias added once.  Result stays vreg-resident
    #     (~2 vregs at these shapes) — no VMEM scratch round-trip.
    gi_all = (
        jnp.dot(x_ref[...], wih_ref[...], preferred_element_type=jnp.float32)
        + gib_ref[...]
    )  # (T*B, 3H) f32

    # Loop-invariant hoists (JAX does not CSE these across an unrolled loop).
    whh = whh_ref[...]                                  # (H, 3H) bf16
    bhh_n = jnp.broadcast_to(bhhn_ref[...], (B, H))     # (B, H)  f32, hoisted bcast

    # (2) Hidden state carried in vregs across a fully-unrolled static-T loop;
    #     static Python t makes every gi slice a cheap vreg extract.
    h = jnp.zeros((B, H), jnp.float32)
    for t in range(T):
        gi = gi_all[t * B:(t + 1) * B, :]               # (B, 3H) static slice
        gh = jnp.dot(h.astype(jnp.bfloat16), whh,
                     preferred_element_type=jnp.float32)  # (B, 3H) bf16 MXU, f32 acc
        # One fused sigmoid over the contiguous [r | z] 2H-lane slice (EUP).
        rz = jax.nn.sigmoid(gi[:, :2 * H] + gh[:, :2 * H])
        r = rz[:, :H]
        z = rz[:, H:]
        # n-gate: b_hh_n sits inside the r* multiply (PyTorch GRU form).
        n = jnp.tanh(gi[:, 2 * H:] + r * (gh[:, 2 * H:] + bhh_n))
        # (4) shorter blend: == (1 - z) * n + z * h, one fewer VALU op.
        h = n + z * (h - n)

    # F.relu on the final hidden state.
    o_ref[...] = jnp.maximum(h, 0.0).astype(o_ref.dtype)


def init_gru_params(key, input_size_per_step, output_size):
    """Deterministic params mimicking PyTorch GRU uniform(-1/sqrt(H), 1/sqrt(H))."""
    H, I = output_size, input_size_per_step
    k = 1.0 / jnp.sqrt(jnp.float32(H))
    k1, k2, k3, k4 = jax.random.split(key, 4)
    w_ih = jax.random.uniform(k1, (3 * H, I), jnp.float32, -k, k)   # [r, z, n] rows
    w_hh = jax.random.uniform(k2, (3 * H, H), jnp.float32, -k, k)
    b_ih = jax.random.uniform(k3, (3 * H,), jnp.float32, -k, k)
    b_hh = jax.random.uniform(k4, (3 * H,), jnp.float32, -k, k)
    return {"w_ih": w_ih, "w_hh": w_hh, "b_ih": b_ih, "b_hh": b_hh}


def gru_attention_encoder_forward(x, params, time_steps, output_size):
    """Layout / bias prep in plain JAX; full GRU recurrence inside one Pallas call."""
    B = x.shape[0]
    T = time_steps
    I = x.shape[1] // T
    H = output_size

    # Time-major flatten (B, T*I) -> (T*B, I); x is ~1 KB here so this relayout
    # is negligible (at scale: feed batch-major and stream via grid index_map).
    # bf16 cast = MXU-native operand + half the DMA bytes.
    x_tm = (
        x.reshape(B, T, I).transpose(1, 0, 2).reshape(T * B, I).astype(jnp.bfloat16)
    )

    w_ih = params["w_ih"].astype(jnp.float32)      # (3H, I)
    w_hh = params["w_hh"].astype(jnp.float32)      # (3H, H)
    b_ih = params["b_ih"].astype(jnp.float32)      # (3H,)
    b_hh = params["b_hh"].astype(jnp.float32)      # (3H,)

    wih_t = w_ih.T.astype(jnp.bfloat16)            # (I, 3H) bf16 MXU operand
    whh_t = w_hh.T.astype(jnp.bfloat16)            # (H, 3H) bf16 MXU operand
    # Fold b_hh's r/z components into the hoisted projection bias (kept f32);
    # only the n-gate hidden bias stays inside the recurrence.
    gi_bias = (
        b_ih + jnp.concatenate([b_hh[: 2 * H], jnp.zeros((H,), jnp.float32)])
    ).reshape(1, 3 * H)
    bhh_n = b_hh[2 * H:].reshape(1, H)

    vmem = pl.BlockSpec(memory_space=pltpu.MemorySpace.VMEM)
    out = pl.pallas_call(
        gru_relu_kernel,
        out_shape=jax.ShapeDtypeStruct((B, H), jnp.float32),
        in_specs=[vmem, vmem, vmem, vmem, vmem],
        out_specs=vmem,
    )(x_tm, wih_t, whh_t, gi_bias, bhh_n)
    return out


def _reference_forward_f32(x, params, time_steps, output_size):
    """Pure-f32 JAX reference of the PyTorch GRU math (semantic ground truth)."""
    B = x.shape[0]
    I = x.size // (B * time_steps)
    H = output_size
    xs = x.reshape(B, time_steps, I).astype(jnp.float32)
    h = jnp.zeros((B, H), jnp.float32)
    w_ih, w_hh, b_ih, b_hh = (params["w_ih"], params["w_hh"],
                              params["b_ih"], params["b_hh"])
    for t in range(time_steps):
        xt = xs[:, t, :]
        gi = xt @ w_ih.T + b_ih
        gh = h @ w_hh.T + b_hh
        i_r, i_z, i_n = gi[:, :H], gi[:, H:2 * H], gi[:, 2 * H:]
        h_r, h_z, h_n = gh[:, :H], gh[:, H:2 * H], gh[:, 2 * H:]
        r = jax.nn.sigmoid(i_r + h_r)
        z = jax.nn.sigmoid(i_z + h_z)
        n = jnp.tanh(i_n + r * h_n)
        h = (1.0 - z) * n + z * h
    return jnp.maximum(h, 0.0)


def _reference_forward_bf16_matched(x, params, time_steps, output_size):
    """Reference mirroring the kernel's numerics exactly (bf16 MXU operands,
    f32 accumulate, folded biases, n + z*(h-n) blend) for a tight check."""
    B = x.shape[0]
    I = x.size // (B * time_steps)
    H = output_size
    xs = x.reshape(B, time_steps, I).astype(jnp.bfloat16)
    w_ih = params["w_ih"].astype(jnp.float32)
    w_hh = params["w_hh"].astype(jnp.float32)
    b_ih = params["b_ih"].astype(jnp.float32)
    b_hh = params["b_hh"].astype(jnp.float32)
    wih_t = w_ih.T.astype(jnp.bfloat16)
    whh_t = w_hh.T.astype(jnp.bfloat16)
    gi_bias = b_ih + jnp.concatenate([b_hh[:2 * H], jnp.zeros((H,), jnp.float32)])
    bhh_n = b_hh[2 * H:]
    h = jnp.zeros((B, H), jnp.float32)
    for t in range(time_steps):
        gi = jnp.dot(xs[:, t, :], wih_t,
                     preferred_element_type=jnp.float32) + gi_bias
        gh = jnp.dot(h.astype(jnp.bfloat16), whh_t,
                     preferred_element_type=jnp.float32)
        rz = jax.nn.sigmoid(gi[:, :2 * H] + gh[:, :2 * H])
        r, z = rz[:, :H], rz[:, H:]
        n = jnp.tanh(gi[:, 2 * H:] + r * (gh[:, 2 * H:] + bhh_n))
        h = n + z * (h - n)
    return jnp.maximum(h, 0.0)


if __name__ == "__main__":
    # Module config: input_size (flattened) = time_steps * per-step input size.
    batch = 2
    time_steps = 8
    input_size_per_step = 16          # => module input_size = 128
    output_size = 32
    # encoding_mode is unused in forward; self.attn Linear is defined but unused.

    key = jax.random.PRNGKey(0)
    kx, kp = jax.random.split(key)
    x = jax.random.normal(kx, (batch, time_steps * input_size_per_step), jnp.float32)
    params = init_gru_params(kp, input_size_per_step, output_size)

    out = gru_attention_encoder_forward(x, params, time_steps, output_size)
    out = jax.block_until_ready(out)
    assert out.shape == (batch, output_size)

    # Tight check vs. a reference with identical bf16-operand / f32-accumulate
    # numerics (validates the kernel's structure and gate math exactly).
    ref_matched = _reference_forward_bf16_matched(x, params, time_steps, output_size)
    assert jnp.allclose(out, ref_matched, atol=1e-4, rtol=1e-4), \
        "mismatch vs bf16-matched reference"

    # Drift bound vs. the pure-f32 PyTorch-semantics reference; tolerance is
    # loosened only to cover bf16 MXU operand rounding through the 8-step
    # recurrence (structural errors would be orders of magnitude larger).
    ref_f32 = _reference_forward_f32(x, params, time_steps, output_size)
    assert jnp.allclose(out, ref_f32, atol=5e-2, rtol=5e-2), \
        "mismatch vs f32 reference beyond bf16 drift bound"

    print("KERNEL_OK")
</pallas_src>

<mosaic_0001>
module attributes {stable_mosaic.version = 11 : i64} {
  func.func @gru_relu_kernel(%arg0: memref<16x16xbf16, #tpu.memory_space<vmem>>, %arg1: memref<16x96xbf16, #tpu.memory_space<vmem>>, %arg2: memref<32x96xbf16, #tpu.memory_space<vmem>>, %arg3: memref<1x96xf32, #tpu.memory_space<vmem>>, %arg4: memref<1x32xf32, #tpu.memory_space<vmem>>, %arg5: memref<2x32xf32, #tpu.memory_space<vmem>>) attributes {dimension_semantics = [], scalar_prefetch = 0 : i64, scratch_operands = 0 : i64, tpu.core_type = #tpu.core_type<tc>} {
    %c0 = arith.constant 0 : index
    %c0_0 = arith.constant 0 : index
    %0 = vector.load %arg0[%c0, %c0_0] : memref<16x16xbf16, #tpu.memory_space<vmem>>, vector<16x16xbf16>
    %c0_1 = arith.constant 0 : index
    %c0_2 = arith.constant 0 : index
    %1 = vector.load %arg1[%c0_1, %c0_2] : memref<16x96xbf16, #tpu.memory_space<vmem>>, vector<16x96xbf16>
    %cst = arith.constant dense<0.000000e+00> : vector<16x96xf32>
    %2 = tpu.matmul %0, %1, %cst {dimension_numbers = #tpu.dot_dimension_numbers<[1], [0], [0], [1], [0, 0, 1, 1], [], []>} : vector<16x16xbf16>, vector<16x96xbf16>, vector<16x96xf32> -> vector<16x96xf32>
    %c0_3 = arith.constant 0 : index
    %c0_4 = arith.constant 0 : index
    %3 = vector.load %arg3[%c0_3, %c0_4] : memref<1x96xf32, #tpu.memory_space<vmem>>, vector<1x96xf32>
    %4 = vector.broadcast %3 : vector<1x96xf32> to vector<16x96xf32>
    %5 = arith.addf %2, %4 : vector<16x96xf32>
    %c0_5 = arith.constant 0 : index
    %c0_6 = arith.constant 0 : index
    %6 = vector.load %arg2[%c0_5, %c0_6] : memref<32x96xbf16, #tpu.memory_space<vmem>>, vector<32x96xbf16>
    %c0_7 = arith.constant 0 : index
    %c0_8 = arith.constant 0 : index
    %7 = vector.load %arg4[%c0_7, %c0_8] : memref<1x32xf32, #tpu.memory_space<vmem>>, vector<1x32xf32>
    %8 = vector.shape_cast %7 : vector<1x32xf32> to vector<1x32xf32>
    %9 = vector.broadcast %8 : vector<1x32xf32> to vector<2x32xf32>
    %cst_9 = arith.constant 0.000000e+00 : f32
    %10 = vector.broadcast %cst_9 : f32 to vector<2x32xf32>
    %11 = vector.extract_strided_slice %5 {offsets = [0, 0], sizes = [2, 96], strides = [1, 1]} : vector<16x96xf32> to vector<2x96xf32>
    %12 = arith.truncf %10 : vector<2x32xf32> to vector<2x32xbf16>
    %cst_10 = arith.constant dense<0.000000e+00> : vector<2x96xf32>
    %13 = tpu.matmul %12, %6, %cst_10 {dimension_numbers = #tpu.dot_dimension_numbers<[1], [0], [0], [1], [0, 0, 1, 1], [], []>} : vector<2x32xbf16>, vector<32x96xbf16>, vector<2x96xf32> -> vector<2x96xf32>
    %14 = vector.extract_strided_slice %11 {offsets = [0, 0], sizes = [2, 64], strides = [1, 1]} : vector<2x96xf32> to vector<2x64xf32>
    %15 = vector.extract_strided_slice %13 {offsets = [0, 0], sizes = [2, 64], strides = [1, 1]} : vector<2x96xf32> to vector<2x64xf32>
    %16 = arith.addf %14, %15 : vector<2x64xf32>
    %17 = arith.negf %16 : vector<2x64xf32>
    %18 = math.exp %17 : vector<2x64xf32>
    %cst_11 = arith.constant 1.000000e+00 : f32
    %19 = vector.broadcast %cst_11 : f32 to vector<2x64xf32>
    %20 = arith.addf %19, %18 : vector<2x64xf32>
    %21 = arith.divf %19, %20 : vector<2x64xf32>
    %22 = vector.extract_strided_slice %21 {offsets = [0, 0], sizes = [2, 32], strides = [1, 1]} : vector<2x64xf32> to vector<2x32xf32>
    %23 = vector.extract_strided_slice %21 {offsets = [0, 32], sizes = [2, 32], strides = [1, 1]} : vector<2x64xf32> to vector<2x32xf32>
    %24 = vector.extract_strided_slice %11 {offsets = [0, 64], sizes = [2, 32], strides = [1, 1]} : vector<2x96xf32> to vector<2x32xf32>
    %25 = vector.extract_strided_slice %13 {offsets = [0, 64], sizes = [2, 32], strides = [1, 1]} : vector<2x96xf32> to vector<2x32xf32>
    %26 = arith.addf %25, %9 : vector<2x32xf32>
    %27 = arith.mulf %22, %26 : vector<2x32xf32>
    %28 = arith.addf %24, %27 : vector<2x32xf32>
    %29 = math.tanh %28 : vector<2x32xf32>
    %30 = arith.subf %10, %29 : vector<2x32xf32>
    %31 = arith.mulf %23, %30 : vector<2x32xf32>
    %32 = arith.addf %29, %31 : vector<2x32xf32>
    %33 = vector.extract_strided_slice %5 {offsets = [2, 0], sizes = [2, 96], strides = [1, 1]} : vector<16x96xf32> to vector<2x96xf32>
    %34 = arith.truncf %32 : vector<2x32xf32> to vector<2x32xbf16>
    %cst_12 = arith.constant dense<0.000000e+00> : vector<2x96xf32>
    %35 = tpu.matmul %34, %6, %cst_12 {dimension_numbers = #tpu.dot_dimension_numbers<[1], [0], [0], [1], [0, 0, 1, 1], [], []>} : vector<2x32xbf16>, vector<32x96xbf16>, vector<2x96xf32> -> vector<2x96xf32>
    %36 = vector.extract_strided_slice %33 {offsets = [0, 0], sizes = [2, 64], strides = [1, 1]} : vector<2x96xf32> to vector<2x64xf32>
    %37 = vector.extract_strided_slice %35 {offsets = [0, 0], sizes = [2, 64], strides = [1, 1]} : vector<2x96xf32> to vector<2x64xf32>
    %38 = arith.addf %36, %37 : vector<2x64xf32>
    %39 = arith.negf %38 : vector<2x64xf32>
    %40 = math.exp %39 : vector<2x64xf32>
    %cst_13 = arith.constant 1.000000e+00 : f32
    %41 = vector.broadcast %cst_13 : f32 to vector<2x64xf32>
    %42 = arith.addf %41, %40 : vector<2x64xf32>
    %43 = arith.divf %41, %42 : vector<2x64xf32>
    %44 = vector.extract_strided_slice %43 {offsets = [0, 0], sizes = [2, 32], strides = [1, 1]} : vector<2x64xf32> to vector<2x32xf32>
    %45 = vector.extract_strided_slice %43 {offsets = [0, 32], sizes = [2, 32], strides = [1, 1]} : vector<2x64xf32> to vector<2x32xf32>
    %46 = vector.extract_strided_slice %33 {offsets = [0, 64], sizes = [2, 32], strides = [1, 1]} : vector<2x96xf32> to vector<2x32xf32>
    %47 = vector.extract_strided_slice %35 {offsets = [0, 64], sizes = [2, 32], strides = [1, 1]} : vector<2x96xf32> to vector<2x32xf32>
    %48 = arith.addf %47, %9 : vector<2x32xf32>
    %49 = arith.mulf %44, %48 : vector<2x32xf32>
    %50 = arith.addf %46, %49 : vector<2x32xf32>
    %51 = math.tanh %50 : vector<2x32xf32>
    %52 = arith.subf %32, %51 : vector<2x32xf32>
    %53 = arith.mulf %45, %52 : vector<2x32xf32>
    %54 = arith.addf %51, %53 : vector<2x32xf32>
    %55 = vector.extract_strided_slice %5 {offsets = [4, 0], sizes = [2, 96], strides = [1, 1]} : vector<16x96xf32> to vector<2x96xf32>
    %56 = arith.truncf %54 : vector<2x32xf32> to vector<2x32xbf16>
    %cst_14 = arith.constant dense<0.000000e+00> : vector<2x96xf32>
    %57 = tpu.matmul %56, %6, %cst_14 {dimension_numbers = #tpu.dot_dimension_numbers<[1], [0], [0], [1], [0, 0, 1, 1], [], []>} : vector<2x32xbf16>, vector<32x96xbf16>, vector<2x96xf32> -> vector<2x96xf32>
    %58 = vector.extract_strided_slice %55 {offsets = [0, 0], sizes = [2, 64], strides = [1, 1]} : vector<2x96xf32> to vector<2x64xf32>
    %59 = vector.extract_strided_slice %57 {offsets = [0, 0], sizes = [2, 64], strides = [1, 1]} : vector<2x96xf32> to vector<2x64xf32>
    %60 = arith.addf %58, %59 : vector<2x64xf32>
    %61 = arith.negf %60 : vector<2x64xf32>
    %62 = math.exp %61 : vector<2x64xf32>
    %cst_15 = arith.constant 1.000000e+00 : f32
    %63 = vector.broadcast %cst_15 : f32 to vector<2x64xf32>
    %64 = arith.addf %63, %62 : vector<2x64xf32>
    %65 = arith.divf %63, %64 : vector<2x64xf32>
    %66 = vector.extract_strided_slice %65 {offsets = [0, 0], sizes = [2, 32], strides = [1, 1]} : vector<2x64xf32> to vector<2x32xf32>
    %67 = vector.extract_strided_slice %65 {offsets = [0, 32], sizes = [2, 32], strides = [1, 1]} : vector<2x64xf32> to vector<2x32xf32>
    %68 = vector.extract_strided_slice %55 {offsets = [0, 64], sizes = [2, 32], strides = [1, 1]} : vector<2x96xf32> to vector<2x32xf32>
    %69 = vector.extract_strided_slice %57 {offsets = [0, 64], sizes = [2, 32], strides = [1, 1]} : vector<2x96xf32> to vector<2x32xf32>
    %70 = arith.addf %69, %9 : vector<2x32xf32>
    %71 = arith.mulf %66, %70 : vector<2x32xf32>
    %72 = arith.addf %68, %71 : vector<2x32xf32>
    %73 = math.tanh %72 : vector<2x32xf32>
    %74 = arith.subf %54, %73 : vector<2x32xf32>
    %75 = arith.mulf %67, %74 : vector<2x32xf32>
    %76 = arith.addf %73, %75 : vector<2x32xf32>
    %77 = vector.extract_strided_slice %5 {offsets = [6, 0], sizes = [2, 96], strides = [1, 1]} : vector<16x96xf32> to vector<2x96xf32>
    %78 = arith.truncf %76 : vector<2x32xf32> to vector<2x32xbf16>
    %cst_16 = arith.constant dense<0.000000e+00> : vector<2x96xf32>
    %79 = tpu.matmul %78, %6, %cst_16 {dimension_numbers = #tpu.dot_dimension_numbers<[1], [0], [0], [1], [0, 0, 1, 1], [], []>} : vector<2x32xbf16>, vector<32x96xbf16>, vector<2x96xf32> -> vector<2x96xf32>
    %80 = vector.extract_strided_slice %77 {offsets = [0, 0], sizes = [2, 64], strides = [1, 1]} : vector<2x96xf32> to vector<2x64xf32>
    %81 = vector.extract_strided_slice %79 {offsets = [0, 0], sizes = [2, 64], strides = [1, 1]} : vector<2x96xf32> to vector<2x64xf32>
    %82 = arith.addf %80, %81 : vector<2x64xf32>
    %83 = arith.negf %82 : vector<2x64xf32>
    %84 = math.exp %83 : vector<2x64xf32>
    %cst_17 = arith.constant 1.000000e+00 : f32
    %85 = vector.broadcast %cst_17 : f32 to vector<2x64xf32>
    %86 = arith.addf %85, %84 : vector<2x64xf32>
    %87 = arith.divf %85, %86 : vector<2x64xf32>
    %88 = vector.extract_strided_slice %87 {offsets = [0, 0], sizes = [2, 32], strides = [1, 1]} : vector<2x64xf32> to vector<2x32xf32>
    %89 = vector.extract_strided_slice %87 {offsets = [0, 32], sizes = [2, 32], strides = [1, 1]} : vector<2x64xf32> to vector<2x32xf32>
    %90 = vector.extract_strided_slice %77 {offsets = [0, 64], sizes = [2, 32], strides = [1, 1]} : vector<2x96xf32> to vector<2x32xf32>
    %91 = vector.extract_strided_slice %79 {offsets = [0, 64], sizes = [2, 32], strides = [1, 1]} : vector<2x96xf32> to vector<2x32xf32>
    %92 = arith.addf %91, %9 : vector<2x32xf32>
    %93 = arith.mulf %88, %92 : vector<2x32xf32>
    %94 = arith.addf %90, %93 : vector<2x32xf32>
    %95 = math.tanh %94 : vector<2x32xf32>
    %96 = arith.subf %76, %95 : vector<2x32xf32>
    %97 = arith.mulf %89, %96 : vector<2x32xf32>
    %98 = arith.addf %95, %97 : vector<2x32xf32>
    %99 = vector.extract_strided_slice %5 {offsets = [8, 0], sizes = [2, 96], strides = [1, 1]} : vector<16x96xf32> to vector<2x96xf32>
    %100 = arith.truncf %98 : vector<2x32xf32> to vector<2x32xbf16>
    %cst_18 = arith.constant dense<0.000000e+00> : vector<2x96xf32>
    %101 = tpu.matmul %100, %6, %cst_18 {dimension_numbers = #tpu.dot_dimension_numbers<[1], [0], [0], [1], [0, 0, 1, 1], [], []>} : vector<2x32xbf16>, vector<32x96xbf16>, vector<2x96xf32> -> vector<2x96xf32>
    %102 = vector.extract_strided_slice %99 {offsets = [0, 0], sizes = [2, 64], strides = [1, 1]} : vector<2x96xf32> to vector<2x64xf32>
    %103 = vector.extract_strided_slice %101 {offsets = [0, 0], sizes = [2, 64], strides = [1, 1]} : vector<2x96xf32> to vector<2x64xf32>
    %104 = arith.addf %102, %103 : vector<2x64xf32>
    %105 = arith.negf %104 : vector<2x64xf32>
    %106 = math.exp %105 : vector<2x64xf32>
    %cst_19 = arith.constant 1.000000e+00 : f32
    %107 = vector.broadcast %cst_19 : f32 to vector<2x64xf32>
    %108 = arith.addf %107, %106 : vector<2x64xf32>
    %109 = arith.divf %107, %108 : vector<2x64xf32>
    %110 = vector.extract_strided_slice %109 {offsets = [0, 0], sizes = [2, 32], strides = [1, 1]} : vector<2x64xf32> to vector<2x32xf32>
    %111 = vector.extract_strided_slice %109 {offsets = [0, 32], sizes = [2, 32], strides = [1, 1]} : vector<2x64xf32> to vector<2x32xf32>
    %112 = vector.extract_strided_slice %99 {offsets = [0, 64], sizes = [2, 32], strides = [1, 1]} : vector<2x96xf32> to vector<2x32xf32>
    %113 = vector.extract_strided_slice %101 {offsets = [0, 64], sizes = [2, 32], strides = [1, 1]} : vector<2x96xf32> to vector<2x32xf32>
    %114 = arith.addf %113, %9 : vector<2x32xf32>
    %115 = arith.mulf %110, %114 : vector<2x32xf32>
    %116 = arith.addf %112, %115 : vector<2x32xf32>
    %117 = math.tanh %116 : vector<2x32xf32>
    %118 = arith.subf %98, %117 : vector<2x32xf32>
    %119 = arith.mulf %111, %118 : vector<2x32xf32>
    %120 = arith.addf %117, %119 : vector<2x32xf32>
    %121 = vector.extract_strided_slice %5 {offsets = [10, 0], sizes = [2, 96], strides = [1, 1]} : vector<16x96xf32> to vector<2x96xf32>
    %122 = arith.truncf %120 : vector<2x32xf32> to vector<2x32xbf16>
    %cst_20 = arith.constant dense<0.000000e+00> : vector<2x96xf32>
    %123 = tpu.matmul %122, %6, %cst_20 {dimension_numbers = #tpu.dot_dimension_numbers<[1], [0], [0], [1], [0, 0, 1, 1], [], []>} : vector<2x32xbf16>, vector<32x96xbf16>, vector<2x96xf32> -> vector<2x96xf32>
    %124 = vector.extract_strided_slice %121 {offsets = [0, 0], sizes = [2, 64], strides = [1, 1]} : vector<2x96xf32> to vector<2x64xf32>
    %125 = vector.extract_strided_slice %123 {offsets = [0, 0], sizes = [2, 64], strides = [1, 1]} : vector<2x96xf32> to vector<2x64xf32>
    %126 = arith.addf %124, %125 : vector<2x64xf32>
    %127 = arith.negf %126 : vector<2x64xf32>
    %128 = math.exp %127 : vector<2x64xf32>
    %cst_21 = arith.constant 1.000000e+00 : f32
    %129 = vector.broadcast %cst_21 : f32 to vector<2x64xf32>
    %130 = arith.addf %129, %128 : vector<2x64xf32>
    %131 = arith.divf %129, %130 : vector<2x64xf32>
    %132 = vector.extract_strided_slice %131 {offsets = [0, 0], sizes = [2, 32], strides = [1, 1]} : vector<2x64xf32> to vector<2x32xf32>
    %133 = vector.extract_strided_slice %131 {offsets = [0, 32], sizes = [2, 32], strides = [1, 1]} : vector<2x64xf32> to vector<2x32xf32>
    %134 = vector.extract_strided_slice %121 {offsets = [0, 64], sizes = [2, 32], strides = [1, 1]} : vector<2x96xf32> to vector<2x32xf32>
    %135 = vector.extract_strided_slice %123 {offsets = [0, 64], sizes = [2, 32], strides = [1, 1]} : vector<2x96xf32> to vector<2x32xf32>
    %136 = arith.addf %135, %9 : vector<2x32xf32>
    %137 = arith.mulf %132, %136 : vector<2x32xf32>
    %138 = arith.addf %134, %137 : vector<2x32xf32>
    %139 = math.tanh %138 : vector<2x32xf32>
    %140 = arith.subf %120, %139 : vector<2x32xf32>
    %141 = arith.mulf %133, %140 : vector<2x32xf32>
    %142 = arith.addf %139, %141 : vector<2x32xf32>
    %143 = vector.extract_strided_slice %5 {offsets = [12, 0], sizes = [2, 96], strides = [1, 1]} : vector<16x96xf32> to vector<2x96xf32>
    %144 = arith.truncf %142 : vector<2x32xf32> to vector<2x32xbf16>
    %cst_22 = arith.constant dense<0.000000e+00> : vector<2x96xf32>
    %145 = tpu.matmul %144, %6, %cst_22 {dimension_numbers = #tpu.dot_dimension_numbers<[1], [0], [0], [1], [0, 0, 1, 1], [], []>} : vector<2x32xbf16>, vector<32x96xbf16>, vector<2x96xf32> -> vector<2x96xf32>
    %146 = vector.extract_strided_slice %143 {offsets = [0, 0], sizes = [2, 64], strides = [1, 1]} : vector<2x96xf32> to vector<2x64xf32>
    %147 = vector.extract_strided_slice %145 {offsets = [0, 0], sizes = [2, 64], strides = [1, 1]} : vector<2x96xf32> to vector<2x64xf32>
    %148 = arith.addf %146, %147 : vector<2x64xf32>
    %149 = arith.negf %148 : vector<2x64xf32>
    %150 = math.exp %149 : vector<2x64xf32>
    %cst_23 = arith.constant 1.000000e+00 : f32
    %151 = vector.broadcast %cst_23 : f32 to vector<2x64xf32>
    %152 = arith.addf %151, %150 : vector<2x64xf32>
    %153 = arith.divf %151, %152 : vector<2x64xf32>
    %154 = vector.extract_strided_slice %153 {offsets = [0, 0], sizes = [2, 32], strides = [1, 1]} : vector<2x64xf32> to vector<2x32xf32>
    %155 = vector.extract_strided_slice %153 {offsets = [0, 32], sizes = [2, 32], strides = [1, 1]} : vector<2x64xf32> to vector<2x32xf32>
    %156 = vector.extract_strided_slice %143 {offsets = [0, 64], sizes = [2, 32], strides = [1, 1]} : vector<2x96xf32> to vector<2x32xf32>
    %157 = vector.extract_strided_slice %145 {offsets = [0, 64], sizes = [2, 32], strides = [1, 1]} : vector<2x96xf32> to vector<2x32xf32>
    %158 = arith.addf %157, %9 : vector<2x32xf32>
    %159 = arith.mulf %154, %158 : vector<2x32xf32>
    %160 = arith.addf %156, %159 : vector<2x32xf32>
    %161 = math.tanh %160 : vector<2x32xf32>
    %162 = arith.subf %142, %161 : vector<2x32xf32>
    %163 = arith.mulf %155, %162 : vector<2x32xf32>
    %164 = arith.addf %161, %163 : vector<2x32xf32>
    %165 = vector.extract_strided_slice %5 {offsets = [14, 0], sizes = [2, 96], strides = [1, 1]} : vector<16x96xf32> to vector<2x96xf32>
    %166 = arith.truncf %164 : vector<2x32xf32> to vector<2x32xbf16>
    %cst_24 = arith.constant dense<0.000000e+00> : vector<2x96xf32>
    %167 = tpu.matmul %166, %6, %cst_24 {dimension_numbers = #tpu.dot_dimension_numbers<[1], [0], [0], [1], [0, 0, 1, 1], [], []>} : vector<2x32xbf16>, vector<32x96xbf16>, vector<2x96xf32> -> vector<2x96xf32>
    %168 = vector.extract_strided_slice %165 {offsets = [0, 0], sizes = [2, 64], strides = [1, 1]} : vector<2x96xf32> to vector<2x64xf32>
    %169 = vector.extract_strided_slice %167 {offsets = [0, 0], sizes = [2, 64], strides = [1, 1]} : vector<2x96xf32> to vector<2x64xf32>
    %170 = arith.addf %168, %169 : vector<2x64xf32>
    %171 = arith.negf %170 : vector<2x64xf32>
    %172 = math.exp %171 : vector<2x64xf32>
    %cst_25 = arith.constant 1.000000e+00 : f32
    %173 = vector.broadcast %cst_25 : f32 to vector<2x64xf32>
    %174 = arith.addf %173, %172 : vector<2x64xf32>
    %175 = arith.divf %173, %174 : vector<2x64xf32>
    %176 = vector.extract_strided_slice %175 {offsets = [0, 0], sizes = [2, 32], strides = [1, 1]} : vector<2x64xf32> to vector<2x32xf32>
    %177 = vector.extract_strided_slice %175 {offsets = [0, 32], sizes = [2, 32], strides = [1, 1]} : vector<2x64xf32> to vector<2x32xf32>
    %178 = vector.extract_strided_slice %165 {offsets = [0, 64], sizes = [2, 32], strides = [1, 1]} : vector<2x96xf32> to vector<2x32xf32>
    %179 = vector.extract_strided_slice %167 {offsets = [0, 64], sizes = [2, 32], strides = [1, 1]} : vector<2x96xf32> to vector<2x32xf32>
    %180 = arith.addf %179, %9 : vector<2x32xf32>
    %181 = arith.mulf %176, %180 : vector<2x32xf32>
    %182 = arith.addf %178, %181 : vector<2x32xf32>
    %183 = math.tanh %182 : vector<2x32xf32>
    %184 = arith.subf %164, %183 : vector<2x32xf32>
    %185 = arith.mulf %177, %184 : vector<2x32xf32>
    %186 = arith.addf %183, %185 : vector<2x32xf32>
    %cst_26 = arith.constant 0.000000e+00 : f32
    %187 = vector.broadcast %cst_26 : f32 to vector<2x32xf32>
    %188 = arith.maximumf %186, %187 : vector<2x32xf32>
    %c0_27 = arith.constant 0 : index
    %c0_28 = arith.constant 0 : index
    %189 = vector.load %arg5[%c0_27, %c0_28] : memref<2x32xf32, #tpu.memory_space<vmem>>, vector<2x32xf32>
    tpu.vector_store %arg5[%c0_27, %c0_28], %188 {strides = array<i32>} : memref<2x32xf32, #tpu.memory_space<vmem>>, vector<2x32xf32>,
    return
  }
}

</mosaic_0001>

<bundles_post_ra>
// kernel: tpu_custom_call.1
= control target key start
LH: loop header
LB: loop body
LE: loop exit
PB: predicated region body
PF: predicated region fallthrough
CT: control target
= control target key end

     0   :  { %10 = vsyncpa [#allocation3], 0  ;;  %s1313_s0 = inlined_call_operand.hbm [shape: bf16[16,16], index: 0, kind: input, shape index: {}]   ;;  %s1314_s1 = inlined_call_operand.hbm [shape: bf16[16,96], index: 1, kind: input, shape index: {}]   ;;  %s1315_s2 = inlined_call_operand.hbm [shape: bf16[32,96], index: 2, kind: input, shape index: {}]   ;;  %s1316_s3 = inlined_call_operand.vmem [shape: f32[1,96], index: 3, kind: input, shape index: {}]   ;;  %s1317_s4 = inlined_call_operand.vmem [shape: f32[1,32], index: 4, kind: input, shape index: {}]   ;;  %s1318_s5 = inlined_call_operand.hbm [shape: f32[2,32], index: 5, kind: output, shape index: {}]  }
   0x1   :  { %11 = vsyncpa [#allocation6], 0 }
   0x2   :  { %12 = vsyncpa [#allocation4], 0  ;;  %s1115_s18 = smov [#allocation5]   ;;  %s1116_s20 = smov [#allocation2]  }
   0x3   :  { %s30_s19 = sshll.u32 %s1115_s18, 4  ;;  %s18_s21 = sshll.u32 %s1116_s20, 4  ;;  %s31_s19 = int_to_ptr.vmem [resolvable:$true] %s30_s19  ;;  %s19_s21 = int_to_ptr.vmem [resolvable:$true] %s18_s21 }
   0x4   :  { %s1037_s22 = scalar_lea.vmem %s31_s19, 128  ;;  %p1042_p1 = scmp.lt.s32.totalorder %s31_s19, %s31_s19 }
   0x5   :  { %p1038_p0 = scmp.ne.s32.totalorder %s31_s19, %s1037_s22  ;;  %p1043_p2 = scmp.lt.s32.totalorder %s1037_s22, %s1037_s22 }
   0x7   :  { %p1044_p3 = por %p1043_p2, %p1042_p1 }
   0x9   :  { %p1045_p4 = pnand %p1044_p3, %p1038_p0 }
   0xb   :  { %1048 = shalt.err (!%p1045_p4)
}
   0xc   :  { %s1117_s23 = smov 64   ;;  %s1118_s24 = smov 4  }
   0xd   :  { %36 = dma.hbm_to_vmem [thread:$0]  %s1314_s1, 128, %s31_s19, [#allocation6], %s1117_s23, %s1117_s23, %s1118_s24  }
   0xe   :  { %s1057_s27 = scalar_lea.vmem %s19_s21, 128  ;;  %p1062_p6 = scmp.lt.s32.totalorder %s19_s21, %s19_s21 }
   0xf   :  { %p1058_p5 = scmp.ne.s32.totalorder %s19_s21, %s1057_s27  ;;  %p1063_p7 = scmp.lt.s32.totalorder %s1057_s27, %s1057_s27 }
  0x11   :  { %p1064_p8 = por %p1063_p7, %p1062_p6 }
  0x13   :  { %p1065_p9 = pnand %p1064_p8, %p1058_p5 }
  0x15   :  { %1068 = shalt.err (!%p1065_p9)
}
  0x16   :  { %24 = dma.hbm_to_vmem [thread:$0]  %s1313_s0, 128, %s19_s21, [#allocation3], %s1117_s23, %s1117_s23, %s1118_s24  }
  0x17   :  { %s1119_s30 = smov [#allocation7]  }
  0x18   :  { %s42_s6 = sshll.u32 %s1119_s30, 4  ;;  %s43_s6 = int_to_ptr.vmem [resolvable:$true] %s42_s6 }
  0x19   :  { %s1077_s7 = scalar_lea.vmem %s43_s6, 256  ;;  %p1082_p11 = scmp.lt.s32.totalorder %s43_s6, %s43_s6 }
  0x1a   :  { %p1078_p10 = scmp.ne.s32.totalorder %s43_s6, %s1077_s7  ;;  %p1083_p12 = scmp.lt.s32.totalorder %s1077_s7, %s1077_s7 }
  0x1c   :  { %p1084_p13 = por %p1083_p12, %p1082_p11 }
  0x1e   :  { %p1085_p0 = pnand %p1084_p13, %p1078_p10 }
  0x20   :  { %1088 = shalt.err (!%p1085_p0)
}
  0x21   :  { %48 = dma.hbm_to_vmem [thread:$0]  %s1315_s2, 256, %s43_s6, [#allocation6], %s1117_s23, %s1117_s23, %s1118_s24  }
  0x22   :  { %1109 = dma.done.wait [#allocation3], 128  }
  0x23   :  { %1110 = vsyncadd [#allocation3], 4294967168 }
  0x24   :  { %1111 = dma.done.wait [#allocation6], 384  }
  0x25   :  { %1112 = vsyncadd [#allocation6], 4294966912  ;;  %v1120_v0 = vmov 0.0   ;;  %vm1121_vm0 = vmmov 0   ;;  %v1177_v1 = vld [vmem:[#allocation7 + $0x8] sm:$0xff]   ;;  %v978_v2 = vld [vmem:[#allocation5] sm:$0xff]  }
  0x26   :  { %902 = vmatprep.subr.bf16.mxu1 %v1120_v0  ;;  %896 = vmatprep.subr.bf16.mxu0 %v1120_v0  ;;  %v1180_v3 = vld [vmem:[#allocation7] sm:$0xff]   ;;  %v980_v4 = vld [vmem:[#allocation2] sm:$0xff]   ;;  %vm85_vm1 = vcmask 130048   ;;  %v1122_v6 = vmov 0   ;;  %s1124_s10 = smov 32   ;;  %vm152_vm2 = vcmask 261120  }
  0x27   :  { %898 = vmatprep.mubr.msk.bf16.mxu0 %vm1121_vm0, %v1120_v0  ;;  %906 = vmatprep.mubr.msk.bf16.mxu1 %vm1121_vm0, %v1120_v0  ;;  %v852_v5 = vld [vmem:[%s1317_s4] ss:$0 sm:$0xff]  ;;  %s1125_s11 = smov [#allocation8]   ;;  %vm830_vm3 = vcmask 261126  }
  0x28   :  { %903 = vmatpush3.bf16.msra.mxu1 %v1177_v1  ;;  %897 = vmatpush3.bf16.msra.mxu0 %v978_v2  ;;  %v848_v11 = vld [vmem:[%s1316_s3] ss:$0 sm:$0xff]  ;;  %s1123_s3 = smov 96   ;;  %s838_s12 = sshll.u32 %s1125_s11, 4  ;;  %s839_s12 = int_to_ptr.vmem [resolvable:$true] %s838_s12 }
  0x29   :  { %904 = vmatprep.subr.bf16.mxu1 %v1120_v0  ;;  %910 = vmatprep.subr.bf16.mxu0 %v1120_v0  ;;  %s1089_s13 = scalar_lea.vmem %s839_s12, 32  ;;  %p1094_p2 = scmp.lt.s32.totalorder %s839_s12, %s839_s12 }
  0x2a   :  { %203 = vrot.lane.b32.xlu0 %v852_v5, %s1117_s23  ;;  %p1090_p1 = scmp.ne.s32.totalorder %s839_s12, %s1089_s13  ;;  %p1095_p3 = scmp.lt.s32.totalorder %s1089_s13, %s1089_s13 }
  0x2b   :  { %899 = vmatmul.mubr.msk.bf16.vlgmr.msra.gmra.mxu0 %vm85_vm1, %v980_v4 }
  0x2c   :  { %905 = vmatpush3.bf16.msra.mxu1 %v1180_v3  ;;  %911 = vmatpush3.bf16.msra.mxu0 %v1177_v1  ;;  %p1096_p4 = por %p1095_p3, %p1094_p2 }
  0x2d   :  { %914 = vmatprep.mubr.msk.bf16.mxu0 %vm1121_vm0, %v1120_v0  ;;  %912 = vmatprep.subr.bf16.mxu0 %v1120_v0 }
  0x2e   :  { %918 = vmatprep.subr.bf16.mxu1 %v1120_v0  ;;  %p1097_p5 = pnand %p1096_p4, %p1090_p1 }
  0x2f   :  { %907 = vmatmul.mubr.bf16.vlgmr.msra.gmra.mxu1 %v1122_v6 }
  0x30   :  { %919 = vmatpush3.bf16.msra.mxu1 %v1177_v1  ;;  %922 = vmatprep.mubr.msk.bf16.mxu1 %vm1121_vm0, %v1120_v0 }
  0x31   :  { %913 = vmatpush3.bf16.msra.mxu0 %v1180_v3  ;;  %920 = vmatprep.subr.bf16.mxu1 %v1120_v0 }
  0x32   :  { %926 = vmatprep.subr.bf16.mxu0 %v1120_v0 }
  0x34   :  { %921 = vmatpush3.bf16.msra.mxu1 %v1180_v3 }
  0x35   :  { %934 = vmatprep.subr.bf16.mxu1 %v1120_v0 }
  0x9c   :  { %v1202_v8 = vpop.permute.xlu0 %203 }
  0xeb   :  { %v123_v7 = vpop.f32.mrf.mxu0 }
  0xec   :  { %v1211_v19 = vadd.f32 %v848_v11, %v123_v7 }
  0xed   :  { %v900_v9 = vpop.f32.mrf.mxu0 }
  0xef   :  { %v190_v10 = vpop.f32.mrf.mxu1  ;;  %v126_v13 = vpop.f32.mrf.mxu0 }
  0xf0   :  { %v206_v12 = vadd.f32 %v1202_v8, %v190_v10  ;;  %v1208_v15 = vadd.f32 %v848_v11, %v126_v13  ;;  %v196_v20 = vadd.f32 %v190_v10, %v1211_v19 }
  0xf1   :  { %v908_v14 = vpop.f32.mrf.mxu1  ;;  %v901_v16 = vpop.f32.mrf.mxu0 }
  0xf2   :  { %208 = vrot.lane.b32.xlu0 %v206_v12, %s1117_s23  ;;  %v855_v21 = vmul.f32 -1.442695, %v196_v20 }
  0xf3   :  { %v193_v17 = vpop.f32.mrf.mxu1 }
  0xf4   :  { %981 = vpow2.f32 %v855_v21 }
  0xf5   :  { %v909_v18 = vpop.f32.mrf.mxu1 }
 0x101   :  { %v982_v22 = vpop.eup %981 }
 0x102   :  { %v200_v23 = vadd.f32 1.0, %v982_v22 }
 0x104   :  { %983 = vrcp.f32 %v200_v23 }
 0x111   :  { %v984_v24 = vpop.eup %983 }
 0x164   :  { %v209_v25 = vpop.permute.xlu0 %208 }
 0x165   :  { %v211_v26 = vmul.f32 %v984_v24, %v209_v25 }
 0x167   :  { %213 = vrot.lane.b32.xlu1 %v211_v26, %s1117_s23 }
 0x1d9   :  { %v214_v27 = vpop.permute.xlu1 %213 }
 0x1da   :  { %v216_v28 = vadd.f32 %v214_v27, %v1211_v19 }
 0x1dc   :  { %985 = vtanh.f32 %v216_v28 }
 0x1e9   :  { %v986_v29 = vpop.eup %985 }
 0x1ea   :  { %v218_v30 = vsub.f32 0.0, %v986_v29 }
 0x1ec   :  { %220 = vrot.lane.b32.xlu1 %v218_v30, %s1123_s3 }
 0x25e   :  { %v221_v31 = vpop.permute.xlu1 %220 }
 0x25f   :  { %v223_v32 = vmul.f32 %v984_v24, %v221_v31 }
 0x261   :  { %225 = vrot.lane.b32.xlu0 %v223_v32, %s1124_s10 }
 0x2d3   :  { %v226_v33 = vpop.permute.xlu0 %225 }
 0x2d4   :  { %v228_v34 = vadd.f32 %v986_v29, %v226_v33 }
 0x2d6   :  { %v229_v35 = vpack.c.bf16 %v228_v34, %v228_v34 }
 0x2d8   :  { %231 = vrot.lane.b32.xlu1 %v229_v35, %s1117_s23 }
 0x34a   :  { %v232_v36 = vpop.permute.xlu1 %231 }
 0x34b   :  { %915 = vmatmul.mubr.msk.bf16.vlgmr.msra.gmra.mxu0 %vm152_vm2, %v232_v36 }
 0x34c   :  { %927 = vmatpush3.bf16.msra.mxu0 %v1177_v1  ;;  %930 = vmatprep.mubr.msk.bf16.mxu0 %vm1121_vm0, %v1120_v0 }
 0x34d   :  { %928 = vmatprep.subr.bf16.mxu0 %v1120_v0 }
 0x350   :  { %929 = vmatpush3.bf16.msra.mxu0 %v1180_v3 }
 0x351   :  { %942 = vmatprep.subr.bf16.mxu0 %v1120_v0 }
 0x40b   :  { %v270_v37 = vpop.f32.mrf.mxu0 }
 0x40c   :  { %v286_v38 = vadd.f32 %v270_v37, %v1202_v8  ;;  %v277_v43 = vrot.slane %v270_v37, 6 }
 0x40d   :  { %v916_v39 = vpop.f32.mrf.mxu0 }
 0x40e   :  { %v288_v40 = vrot.slane %v286_v38, 6  ;;  %v279_v44 = vadd.f32 %v277_v43, %v1211_v19 }
 0x40f   :  { %v273_v41 = vpop.f32.mrf.mxu0 }
 0x410   :  { %289 = vrot.lane.b32.xlu0 %v288_v40, %s1117_s23  ;;  %v857_v45 = vmul.f32 -1.442695, %v279_v44 }
 0x411   :  { %v917_v42 = vpop.f32.mrf.mxu0 }
 0x412   :  { %987 = vpow2.f32 %v857_v45 }
 0x41f   :  { %v988_v46 = vpop.eup %987 }
 0x420   :  { %v283_v47 = vadd.f32 1.0, %v988_v46 }
 0x422   :  { %989 = vrcp.f32 %v283_v47 }
 0x42f   :  { %v990_v48 = vpop.eup %989 }
 0x482   :  { %v290_v49 = vpop.permute.xlu0 %289 }
 0x483   :  { %v292_v50 = vmul.f32 %v990_v48, %v290_v49 }
 0x485   :  { %294 = vrot.lane.b32.xlu1 %v292_v50, %s1117_s23 }
 0x4f7   :  { %v295_v51 = vpop.permute.xlu1 %294 }
 0x4f8   :  { %v297_v52 = vadd.f32 %v295_v51, %v1211_v19 }
 0x4fa   :  { %991 = vtanh.f32 %v297_v52 }
 0x507   :  { %v992_v53 = vpop.eup %991 }
 0x508   :  { %v300_v54 = vrot.slane %v992_v53, 2 }
 0x50a   :  { %v302_v55 = vsub.f32 %v228_v34, %v300_v54 }
 0x50c   :  { %v304_v56 = vrot.slane %v302_v55, 6 }
 0x50e   :  { %305 = vrot.lane.b32.xlu0 %v304_v56, %s1123_s3 }
 0x580   :  { %v306_v57 = vpop.permute.xlu0 %305 }
 0x581   :  { %v308_v58 = vmul.f32 %v990_v48, %v306_v57 }
 0x583   :  { %310 = vrot.lane.b32.xlu1 %v308_v58, %s1124_s10 }
 0x5f5   :  { %v311_v59 = vpop.permute.xlu1 %310 }
 0x5f6   :  { %v313_v60 = vadd.f32 %v992_v53, %v311_v59 }
 0x5f8   :  { %v314_v61 = vpack.c.bf16 %v313_v60, %v313_v60 }
 0x5fa   :  { %v316_v62 = vrot.slane %v314_v61, 1 }
 0x5fc   :  { %317 = vrot.lane.b32.xlu0 %v316_v62, %s1117_s23 }
 0x66e   :  { %v318_v63 = vpop.permute.xlu0 %317 }
 0x66f   :  { %923 = vmatmul.mubr.msk.bf16.vlgmr.msra.gmra.mxu1 %vm152_vm2, %v318_v63 }
 0x670   :  { %935 = vmatpush3.bf16.msra.mxu1 %v1177_v1  ;;  %938 = vmatprep.mubr.msk.bf16.mxu1 %vm1121_vm0, %v1120_v0 }
 0x671   :  { %936 = vmatprep.subr.bf16.mxu1 %v1120_v0 }
 0x674   :  { %937 = vmatpush3.bf16.msra.mxu1 %v1180_v3 }
 0x675   :  { %950 = vmatprep.subr.bf16.mxu1 %v1120_v0 }
 0x72f   :  { %v356_v2 = vpop.f32.mrf.mxu1 }
 0x730   :  { %v372_v4 = vadd.f32 %v356_v2, %v1202_v8  ;;  %v363_v10 = vrot.slane %v356_v2, 4 }
 0x731   :  { %v924_v5 = vpop.f32.mrf.mxu1 }
 0x732   :  { %v374_v6 = vrot.slane %v372_v4, 4  ;;  %v365_v11 = vadd.f32 %v363_v10, %v1211_v19 }
 0x733   :  { %v359_v7 = vpop.f32.mrf.mxu1 }
 0x734   :  { %375 = vrot.lane.b32.xlu1 %v374_v6, %s1117_s23  ;;  %v859_v12 = vmul.f32 -1.442695, %v365_v11 }
 0x735   :  { %v925_v9 = vpop.f32.mrf.mxu1 }
 0x736   :  { %993 = vpow2.f32 %v859_v12 }
 0x743   :  { %v994_v13 = vpop.eup %993 }
 0x744   :  { %v369_v14 = vadd.f32 1.0, %v994_v13 }
 0x746   :  { %995 = vrcp.f32 %v369_v14 }
 0x753   :  { %v996_v16 = vpop.eup %995 }
 0x7a6   :  { %v376_v17 = vpop.permute.xlu1 %375 }
 0x7a7   :  { %v378_v18 = vmul.f32 %v996_v16, %v376_v17 }
 0x7a9   :  { %380 = vrot.lane.b32.xlu0 %v378_v18, %s1117_s23 }
 0x81b   :  { %v381_v20 = vpop.permute.xlu0 %380 }
 0x81c   :  { %v383_v21 = vadd.f32 %v381_v20, %v1211_v19 }
 0x81e   :  { %997 = vtanh.f32 %v383_v21 }
 0x82b   :  { %v998_v22 = vpop.eup %997 }
 0x82c   :  { %v386_v23 = vrot.slane %v998_v22, 2 }
 0x82e   :  { %v388_v24 = vsub.f32 %v313_v60, %v386_v23 }
 0x830   :  { %v390_v25 = vrot.slane %v388_v24, 6 }
 0x832   :  { %391 = vrot.lane.b32.xlu1 %v390_v25, %s1123_s3 }
 0x8a4   :  { %v392_v26 = vpop.permute.xlu1 %391 }
 0x8a5   :  { %v394_v27 = vmul.f32 %v996_v16, %v392_v26 }
 0x8a7   :  { %396 = vrot.lane.b32.xlu0 %v394_v27, %s1124_s10 }
 0x919   :  { %v397_v28 = vpop.permute.xlu0 %396 }
 0x91a   :  { %v399_v29 = vadd.f32 %v998_v22, %v397_v28 }
 0x91c   :  { %v400_v30 = vpack.c.bf16 %v399_v29, %v399_v29 }
 0x91e   :  { %v402_v31 = vrot.slane %v400_v30, 2 }
 0x920   :  { %403 = vrot.lane.b32.xlu1 %v402_v31, %s1117_s23 }
 0x992   :  { %v404_v32 = vpop.permute.xlu1 %403 }
 0x993   :  { %931 = vmatmul.mubr.msk.bf16.vlgmr.msra.gmra.mxu0 %vm152_vm2, %v404_v32 }
 0x994   :  { %943 = vmatpush3.bf16.msra.mxu0 %v1177_v1  ;;  %946 = vmatprep.mubr.msk.bf16.mxu0 %vm1121_vm0, %v1120_v0 }
 0x995   :  { %944 = vmatprep.subr.bf16.mxu0 %v1120_v0 }
 0x998   :  { %945 = vmatpush3.bf16.msra.mxu0 %v1180_v3 }
 0x999   :  { %958 = vmatprep.subr.bf16.mxu0 %v1120_v0 }
 0xa53   :  { %v442_v33 = vpop.f32.mrf.mxu0 }
 0xa54   :  { %v458_v34 = vadd.f32 %v442_v33, %v1202_v8  ;;  %v449_v39 = vrot.slane %v442_v33, 2 }
 0xa55   :  { %v932_v35 = vpop.f32.mrf.mxu0 }
 0xa56   :  { %v460_v36 = vrot.slane %v458_v34, 2  ;;  %v451_v40 = vadd.f32 %v449_v39, %v1211_v19 }
 0xa57   :  { %v445_v37 = vpop.f32.mrf.mxu0 }
 0xa58   :  { %461 = vrot.lane.b32.xlu0 %v460_v36, %s1117_s23  ;;  %v861_v41 = vmul.f32 -1.442695, %v451_v40 }
 0xa59   :  { %v933_v38 = vpop.f32.mrf.mxu0 }
 0xa5a   :  { %999 = vpow2.f32 %v861_v41 }
 0xa67   :  { %v1000_v42 = vpop.eup %999 }
 0xa68   :  { %v455_v43 = vadd.f32 1.0, %v1000_v42 }
 0xa6a   :  { %1001 = vrcp.f32 %v455_v43 }
 0xa77   :  { %v1002_v44 = vpop.eup %1001 }
 0xaca   :  { %v462_v45 = vpop.permute.xlu0 %461 }
 0xacb   :  { %v464_v46 = vmul.f32 %v1002_v44, %v462_v45 }
 0xacd   :  { %466 = vrot.lane.b32.xlu1 %v464_v46, %s1117_s23 }
 0xb3f   :  { %v467_v47 = vpop.permute.xlu1 %466 }
 0xb40   :  { %v469_v48 = vadd.f32 %v467_v47, %v1211_v19 }
 0xb42   :  { %1003 = vtanh.f32 %v469_v48 }
 0xb4f   :  { %v1004_v49 = vpop.eup %1003 }
 0xb50   :  { %v472_v50 = vrot.slane %v1004_v49, 2 }
 0xb52   :  { %v474_v51 = vsub.f32 %v399_v29, %v472_v50 }
 0xb54   :  { %v476_v52 = vrot.slane %v474_v51, 6 }
 0xb56   :  { %477 = vrot.lane.b32.xlu0 %v476_v52, %s1123_s3 }
 0xbc8   :  { %v478_v53 = vpop.permute.xlu0 %477 }
 0xbc9   :  { %v480_v54 = vmul.f32 %v1002_v44, %v478_v53 }
 0xbcb   :  { %482 = vrot.lane.b32.xlu1 %v480_v54, %s1124_s10 }
 0xc3d   :  { %v483_v55 = vpop.permute.xlu1 %482 }
 0xc3e   :  { %v485_v56 = vadd.f32 %v1004_v49, %v483_v55 }
 0xc40   :  { %v486_v57 = vpack.c.bf16 %v485_v56, %v485_v56 }
 0xc42   :  { %v488_v58 = vrot.slane %v486_v57, 3 }
 0xc44   :  { %489 = vrot.lane.b32.xlu0 %v488_v58, %s1117_s23 }
 0xcb6   :  { %v490_v59 = vpop.permute.xlu0 %489 }
 0xcb7   :  { %939 = vmatmul.mubr.msk.bf16.vlgmr.msra.gmra.mxu1 %vm152_vm2, %v490_v59 }
 0xcb8   :  { %951 = vmatpush3.bf16.msra.mxu1 %v1177_v1  ;;  %954 = vmatprep.mubr.msk.bf16.mxu1 %vm1121_vm0, %v1120_v0 }
 0xcb9   :  { %952 = vmatprep.subr.bf16.mxu1 %v1120_v0 }
 0xcbc   :  { %953 = vmatpush3.bf16.msra.mxu1 %v1180_v3 }
 0xd77   :  { %v528_v19 = vpop.f32.mrf.mxu1 }
 0xd78   :  { %v541_v60 = vadd.f32 %v528_v19, %v1202_v8  ;;  %v534_v2 = vadd.f32 %v528_v19, %v1208_v15 }
 0xd79   :  { %v940_v61 = vpop.f32.mrf.mxu1 }
 0xd7a   :  { %543 = vrot.lane.b32.xlu1 %v541_v60, %s1117_s23  ;;  %v863_v4 = vmul.f32 -1.442695, %v534_v2 }
 0xd7b   :  { %v531_v62 = vpop.f32.mrf.mxu1 }
 0xd7c   :  { %1005 = vpow2.f32 %v863_v4 }
 0xd7d   :  { %v941_v63 = vpop.f32.mrf.mxu1 }
 0xd89   :  { %v1006_v5 = vpop.eup %1005 }
 0xd8a   :  { %v538_v6 = vadd.f32 1.0, %v1006_v5 }
 0xd8c   :  { %1007 = vrcp.f32 %v538_v6 }
 0xd99   :  { %v1008_v7 = vpop.eup %1007 }
 0xdec   :  { %v544_v9 = vpop.permute.xlu1 %543 }
 0xded   :  { %v546_v10 = vmul.f32 %v1008_v7, %v544_v9 }
 0xdef   :  { %548 = vrot.lane.b32.xlu0 %v546_v10, %s1117_s23 }
 0xe61   :  { %v549_v11 = vpop.permute.xlu0 %548 }
 0xe62   :  { %v551_v12 = vadd.f32 %v549_v11, %v1208_v15 }
 0xe64   :  { %1009 = vtanh.f32 %v551_v12 }
 0xe71   :  { %v1010_v13 = vpop.eup %1009 }
 0xe72   :  { %v554_v14 = vrot.slane %v1010_v13, 2 }
 0xe74   :  { %v556_v16 = vsub.f32 %v485_v56, %v554_v14 }
 0xe76   :  { %v558_v17 = vrot.slane %v556_v16, 6 }
 0xe78   :  { %559 = vrot.lane.b32.xlu1 %v558_v17, %s1123_s3 }
 0xeea   :  { %v560_v18 = vpop.permute.xlu1 %559 }
 0xeeb   :  { %v562_v20 = vmul.f32 %v1008_v7, %v560_v18 }
 0xeed   :  { %564 = vrot.lane.b32.xlu0 %v562_v20, %s1124_s10 }
 0xf5f   :  { %v565_v21 = vpop.permute.xlu0 %564 }
 0xf60   :  { %v567_v22 = vadd.f32 %v1010_v13, %v565_v21 }
 0xf62   :  { %v568_v23 = vpack.c.bf16 %v567_v22, %v567_v22 }
 0xf64   :  { %570 = vrot.lane.b32.xlu1 %v568_v23, %s1117_s23 }
 0xfd6   :  { %v571_v24 = vpop.permute.xlu1 %570 }
 0xfd7   :  { %947 = vmatmul.mubr.msk.bf16.vlgmr.msra.gmra.mxu0 %vm152_vm2, %v571_v24 }
 0xfd8   :  { %959 = vmatpush3.bf16.msra.mxu0 %v1177_v1  ;;  %962 = vmatprep.mubr.msk.bf16.mxu0 %vm1121_vm0, %v1120_v0 }
 0xfd9   :  { %960 = vmatprep.subr.bf16.mxu0 %v1120_v0 }
 0xfdc   :  { %961 = vmatpush3.bf16.msra.mxu0 %v1180_v3 }
0x1097   :  { %v609_v25 = vpop.f32.mrf.mxu0 }
0x1098   :  { %v625_v26 = vadd.f32 %v609_v25, %v1202_v8  ;;  %v616_v31 = vrot.slane %v609_v25, 6 }
0x1099   :  { %v948_v27 = vpop.f32.mrf.mxu0 }
0x109a   :  { %v627_v28 = vrot.slane %v625_v26, 6  ;;  %v618_v32 = vadd.f32 %v616_v31, %v1208_v15 }
0x109b   :  { %v612_v29 = vpop.f32.mrf.mxu0 }
0x109c   :  { %628 = vrot.lane.b32.xlu0 %v627_v28, %s1117_s23  ;;  %v865_v1 = vmul.f32 -1.442695, %v618_v32 }
0x109d   :  { %v949_v30 = vpop.f32.mrf.mxu0 }
0x109e   :  { %1011 = vpow2.f32 %v865_v1 }
0x10ab   :  { %v1012_v33 = vpop.eup %1011 }
0x10ac   :  { %v622_v34 = vadd.f32 1.0, %v1012_v33 }
0x10ae   :  { %1013 = vrcp.f32 %v622_v34 }
0x10bb   :  { %v1014_v0 = vpop.eup %1013 }
0x110e   :  { %v629_v35 = vpop.permute.xlu0 %628 }
0x110f   :  { %v631_v3 = vmul.f32 %v1014_v0, %v629_v35 }
0x1111   :  { %633 = vrot.lane.b32.xlu1 %v631_v3, %s1117_s23 }
0x1183   :  { %v634_v36 = vpop.permute.xlu1 %633 }
0x1184   :  { %v636_v37 = vadd.f32 %v634_v36, %v1208_v15 }
0x1186   :  { %1015 = vtanh.f32 %v636_v37 }
0x1193   :  { %v1016_v38 = vpop.eup %1015 }
0x1194   :  { %v639_v39 = vrot.slane %v1016_v38, 2 }
0x1196   :  { %v641_v40 = vsub.f32 %v567_v22, %v639_v39 }
0x1198   :  { %v643_v41 = vrot.slane %v641_v40, 6 }
0x119a   :  { %644 = vrot.lane.b32.xlu0 %v643_v41, %s1123_s3 }
0x120c   :  { %v645_v42 = vpop.permute.xlu0 %644 }
0x120d   :  { %v647_v43 = vmul.f32 %v1014_v0, %v645_v42 }
0x120f   :  { %649 = vrot.lane.b32.xlu1 %v647_v43, %s1124_s10 }
0x1281   :  { %v650_v44 = vpop.permute.xlu1 %649 }
0x1282   :  { %v652_v45 = vadd.f32 %v1016_v38, %v650_v44 }
0x1284   :  { %v653_v46 = vpack.c.bf16 %v652_v45, %v652_v45 }
0x1286   :  { %v655_v47 = vrot.slane %v653_v46, 1 }
0x1288   :  { %656 = vrot.lane.b32.xlu0 %v655_v47, %s1117_s23 }
0x12fa   :  { %v657_v48 = vpop.permute.xlu0 %656 }
0x12fb   :  { %955 = vmatmul.mubr.msk.bf16.vlgmr.msra.gmra.mxu1 %vm152_vm2, %v657_v48 }
0x13bb   :  { %v695_v49 = vpop.f32.mrf.mxu1 }
0x13bc   :  { %v711_v50 = vadd.f32 %v695_v49, %v1202_v8  ;;  %v702_v55 = vrot.slane %v695_v49, 4 }
0x13bd   :  { %v956_v51 = vpop.f32.mrf.mxu1 }
0x13be   :  { %v713_v52 = vrot.slane %v711_v50, 4  ;;  %v704_v56 = vadd.f32 %v702_v55, %v1208_v15 }
0x13bf   :  { %v698_v53 = vpop.f32.mrf.mxu1 }
0x13c0   :  { %714 = vrot.lane.b32.xlu1 %v713_v52, %s1117_s23  ;;  %v867_v57 = vmul.f32 -1.442695, %v704_v56 }
0x13c1   :  { %v957_v54 = vpop.f32.mrf.mxu1 }
0x13c2   :  { %1017 = vpow2.f32 %v867_v57 }
0x13cf   :  { %v1018_v58 = vpop.eup %1017 }
0x13d0   :  { %v708_v59 = vadd.f32 1.0, %v1018_v58 }
0x13d2   :  { %1019 = vrcp.f32 %v708_v59 }
0x13df   :  { %v1020_v19 = vpop.eup %1019 }
0x1432   :  { %v715_v60 = vpop.permute.xlu1 %714 }
0x1433   :  { %v717_v61 = vmul.f32 %v1020_v19, %v715_v60 }
0x1435   :  { %719 = vrot.lane.b32.xlu0 %v717_v61, %s1117_s23 }
0x14a7   :  { %v720_v62 = vpop.permute.xlu0 %719 }
0x14a8   :  { %v722_v63 = vadd.f32 %v720_v62, %v1208_v15 }
0x14aa   :  { %1021 = vtanh.f32 %v722_v63 }
0x14b7   :  { %v1022_v2 = vpop.eup %1021 }
0x14b8   :  { %v725_v4 = vrot.slane %v1022_v2, 2 }
0x14ba   :  { %v727_v5 = vsub.f32 %v652_v45, %v725_v4 }
0x14bc   :  { %v729_v6 = vrot.slane %v727_v5, 6 }
0x14be   :  { %730 = vrot.lane.b32.xlu1 %v729_v6, %s1123_s3 }
0x1530   :  { %v731_v7 = vpop.permute.xlu1 %730 }
0x1531   :  { %v733_v9 = vmul.f32 %v1020_v19, %v731_v7 }
0x1533   :  { %735 = vrot.lane.b32.xlu0 %v733_v9, %s1124_s10 }
0x15a5   :  { %v736_v10 = vpop.permute.xlu0 %735 }
0x15a6   :  { %v738_v11 = vadd.f32 %v1022_v2, %v736_v10 }
0x15a8   :  { %v739_v12 = vpack.c.bf16 %v738_v11, %v738_v11 }
0x15aa   :  { %v741_v13 = vrot.slane %v739_v12, 2 }
0x15ac   :  { %742 = vrot.lane.b32.xlu1 %v741_v13, %s1117_s23 }
0x161e   :  { %v743_v14 = vpop.permute.xlu1 %742 }
0x161f   :  { %963 = vmatmul.mubr.msk.bf16.vlgmr.msra.gmra.mxu0 %vm152_vm2, %v743_v14 }
0x16df   :  { %v781_v16 = vpop.f32.mrf.mxu0 }
0x16e0   :  { %v797_v17 = vadd.f32 %v781_v16, %v1202_v8  ;;  %v788_v23 = vrot.slane %v781_v16, 2 }
0x16e1   :  { %v964_v18 = vpop.f32.mrf.mxu0 }
0x16e2   :  { %v799_v20 = vrot.slane %v797_v17, 2  ;;  %v790_v24 = vadd.f32 %v788_v23, %v1208_v15 }
0x16e3   :  { %v784_v21 = vpop.f32.mrf.mxu0 }
0x16e4   :  { %800 = vrot.lane.b32.xlu0 %v799_v20, %s1117_s23  ;;  %v869_v25 = vmul.f32 -1.442695, %v790_v24 }
0x16e5   :  { %v965_v22 = vpop.f32.mrf.mxu0 }
0x16e6   :  { %1023 = vpow2.f32 %v869_v25 }
0x16f3   :  { %v1024_v26 = vpop.eup %1023 }
0x16f4   :  { %v794_v27 = vadd.f32 1.0, %v1024_v26 }
0x16f6   :  { %1025 = vrcp.f32 %v794_v27 }
0x1703   :  { %v1026_v28 = vpop.eup %1025 }
0x1756   :  { %v801_v29 = vpop.permute.xlu0 %800 }
0x1757   :  { %v803_v30 = vmul.f32 %v1026_v28, %v801_v29 }
0x1759   :  { %805 = vrot.lane.b32.xlu1 %v803_v30, %s1117_s23 }
0x17cb   :  { %v806_v8 = vpop.permute.xlu1 %805 }
0x17cc   :  { %v808_v31 = vadd.f32 %v806_v8, %v1208_v15 }
0x17ce   :  { %1027 = vtanh.f32 %v808_v31 }
0x17db   :  { %v1028_v32 = vpop.eup %1027 }
0x17dc   :  { %v811_v1 = vrot.slane %v1028_v32, 2 }
0x17de   :  { %v813_v33 = vsub.f32 %v738_v11, %v811_v1 }
0x17e0   :  { %v815_v34 = vrot.slane %v813_v33, 6 }
0x17e2   :  { %816 = vrot.lane.b32.xlu0 %v815_v34, %s1123_s3 }
0x1854   :  { %v817_v0 = vpop.permute.xlu0 %816 }
0x1855   :  { %v819_v35 = vmul.f32 %v1026_v28, %v817_v0 }
0x1857   :  { %821 = vrot.lane.b32.xlu1 %v819_v35, %s1124_s10 }
0x18c9   :  { %v822_v3 = vpop.permute.xlu1 %821 }
0x18ca   :  { %v824_v36 = vadd.f32 %v1028_v32, %v822_v3 }
0x18cc   :  { %v825_v37 = vmax.f32 %v824_v36, 0.0 }
0x18ce   :  { %827 = vrot.lane.b32.xlu0 %v825_v37, %s1117_s23 }
0x1940   :  { %v828_v15 = vpop.permute.xlu0 %827 }
0x1941   :  { %831 = vst.msk [vmem:[#allocation8 - $0x6] sm:$0xc0] %vm830_vm3, %v828_v15 }
0x1942   :  { %1100 = shalt.err (!%p1097_p5)
}
0x1943   :  { %841 = dma.vmem_to_hbm [thread:$0]  %s839_s12, 32, %s1318_s5, [#allocation4]  }
0x1944   :  { %1113 = dma.done.wait [#allocation4], 32  }
0x1945   :  { %1114 = vsyncadd [#allocation4], 4294967264 }
0x1946   :  { %845 = vsyncpa [#allocation3], 1 }
0x1947   :  { %846 = vsyncpa [#allocation6], 1 }
0x1948   :  { %847 = vsyncpa [#allocation4], 1 }

</bundles_post_ra>
